<compile_context>
chip_gen: v7x
topology: tpu7x:2x2x1
jax: 0.10.0
libtpu: 0.0.40
codegen_flags: <defaults>
</compile_context>

<pallas_src>
import jax
import jax.numpy as jnp
from jax import lax
from jax.experimental import pallas as pl
from jax.experimental.pallas import tpu as pltpu


# ----------------------------------------------------------------------------
# small helpers
# ----------------------------------------------------------------------------
def to_3tuple(x):
    if isinstance(x, (tuple, list)):
        assert len(x) == 3
        return tuple(int(v) for v in x)
    return (int(x),) * 3


def _multiply_integers(t):
    m = 1
    for e in t:
        m *= int(e)
    return m


def _round_up(x, m):
    return ((x + m - 1) // m) * m


def _apply_modulation_type(x, modulation_type="none", groups=None):
    # x: (B, 1, G*J*K, Do, Ho, Wo)
    if modulation_type == "none":
        return x
    if modulation_type == "sigmoid":
        return jax.nn.sigmoid(x)
    if modulation_type == "softmax":
        assert groups is not None
        b, dim, c = x.shape[:3]
        tail = x.shape[3:]
        xr = x.reshape(b, dim, groups, -1, *tail)
        xr = jax.nn.softmax(xr, axis=2)
        return xr.reshape(b, dim, c, *tail)
    raise NotImplementedError(modulation_type)


# ----------------------------------------------------------------------------
# Pallas kernel:  out = W_g @ cols + bias_g     (cols arrive pre-modulated)
# ----------------------------------------------------------------------------
def _dcn_gemm_kernel(w_ref, cols_ref, bias_ref, o_ref):
    # w_ref:    (1, CoutGp, CKp)   bf16   -- resident across inner grid iters
    # cols_ref: (1, 1, CKp, TN)    bf16   -- streamed
    # bias_ref: (1, CoutGp, 1)     f32
    # o_ref:    (1, 1, CoutGp, TN) f32
    acc = jnp.dot(w_ref[0], cols_ref[0, 0],
                  preferred_element_type=jnp.float32)     # MXU, f32 accumulate
    o_ref[0, 0] = (acc + bias_ref[0]).astype(o_ref.dtype)


def _choose_tn(ck_pad, coutg_pad, n_pad, budget_bytes=16 * 1024 * 1024):
    # Per lane-column, double-buffered cost: bf16 cols tile + f32 output tile.
    per_col = 2 * (ck_pad * 2 + coutg_pad * 4)
    tn = budget_bytes // max(per_col, 1)
    tn = max(128, (tn // 128) * 128)
    tn = min(tn, 4096, n_pad)
    return int(tn)


def _dcn_gemm(w_g, cols, bias_g):
    """w_g: (G, CoutG, CK) f32;  cols: (B, G, CK, N) f32 (pre-modulated);
    bias_g: (G, CoutG) f32  ->  (B, G, CoutG, N) f32."""
    G, CoutG, CK = w_g.shape
    B, _, _, N = cols.shape

    CKp = _round_up(CK, 16)        # bf16 sublane packing
    CoGp = _round_up(CoutG, 8)     # f32 sublane alignment of the output tile
    Np = _round_up(N, 128)
    TN = _choose_tn(CKp, CoGp, Np)
    Np = _round_up(Np, TN)
    NT = Np // TN

    w_p = jnp.zeros((G, CoGp, CKp), jnp.bfloat16)
    w_p = w_p.at[:, :CoutG, :CK].set(w_g.astype(jnp.bfloat16))
    cols_p = jnp.zeros((B, G, CKp, Np), jnp.bfloat16)
    cols_p = cols_p.at[:, :, :CK, :N].set(cols.astype(jnp.bfloat16))
    bias_p = jnp.zeros((G, CoGp, 1), jnp.float32)
    bias_p = bias_p.at[:, :CoutG, 0].set(bias_g.astype(jnp.float32))

    out = pl.pallas_call(
        _dcn_gemm_kernel,
        out_shape=jax.ShapeDtypeStruct((B, G, CoGp, Np), jnp.float32),
        # g is the slowest grid axis -> weight/bias blocks stay VMEM-resident
        # across all (b, n) iterations; n-tiling keeps the streamed cols tile
        # small enough to pipeline on v5e/v6e/v7x VMEM.
        grid=(G, B, NT),
        in_specs=[
            pl.BlockSpec((1, CoGp, CKp), lambda g, b, n: (g, 0, 0)),
            pl.BlockSpec((1, 1, CKp, TN), lambda g, b, n: (b, g, 0, n)),
            pl.BlockSpec((1, CoGp, 1), lambda g, b, n: (g, 0, 0)),
        ],
        out_specs=pl.BlockSpec((1, 1, CoGp, TN), lambda g, b, n: (b, g, 0, n)),
        compiler_params=pltpu.CompilerParams(
            dimension_semantics=("parallel", "parallel", "parallel"),
            vmem_limit_bytes=48 * 1024 * 1024),
    )(w_p, cols_p, bias_p)

    return out[:, :, :CoutG, :N]


# ----------------------------------------------------------------------------
# Deformable im2col (trilinear sampling, zero padding outside the volume),
# with the modulation mask folded into the columns.
# TODO(synk): the per-output-location trilinear gather is fully data-dependent
# and stays in plain JAX — no clean Pallas/TPU mapping.
# ----------------------------------------------------------------------------
def _deform_im2col_modulated(x, offset, attn_mask, kernel_size, stride, padding,
                             dilation, groups, off_cpg):
    B, Cin, D, H, W = x.shape
    kd, kh, kw = kernel_size
    sd, sh, sw = stride
    pad_d, pad_h, pad_w = padding
    dl_d, dl_h, dl_w = dilation
    K = kd * kh * kw
    G, J = groups, off_cpg
    Cpg = Cin // (G * J)
    Do, Ho, Wo = offset.shape[-3:]
    N = Do * Ho * Wo

    kd_idx = jnp.repeat(jnp.arange(kd), kh * kw)
    kh_idx = jnp.tile(jnp.repeat(jnp.arange(kh), kw), kd)
    kw_idx = jnp.tile(jnp.arange(kw), kd * kh)

    od = jnp.arange(Do)
    oh = jnp.arange(Ho)
    ow = jnp.arange(Wo)
    # positions / interpolation weights kept in f32 regardless of x.dtype
    base_d = (od[None, :, None, None] * sd - pad_d
              + kd_idx[:, None, None, None] * dl_d).astype(jnp.float32)
    base_h = (oh[None, None, :, None] * sh - pad_h
              + kh_idx[:, None, None, None] * dl_h).astype(jnp.float32)
    base_w = (ow[None, None, None, :] * sw - pad_w
              + kw_idx[:, None, None, None] * dl_w).astype(jnp.float32)

    # offset: (B, 3, G, J, K, Do, Ho, Wo), axis-1 order = (d, h, w)
    pos_d = offset[:, 0].astype(jnp.float32) + base_d
    pos_h = offset[:, 1].astype(jnp.float32) + base_h
    pos_w = offset[:, 2].astype(jnp.float32) + base_w

    d0 = jnp.floor(pos_d)
    h0 = jnp.floor(pos_h)
    w0 = jnp.floor(pos_w)
    fd = pos_d - d0
    fh = pos_h - h0
    fw = pos_w - w0
    d0 = d0.astype(jnp.int32)
    h0 = h0.astype(jnp.int32)
    w0 = w0.astype(jnp.int32)

    x_g = x.reshape(B, G, J, Cpg, D * H * W)

    val = jnp.zeros((B, G, J, Cpg, K, Do, Ho, Wo), jnp.float32)
    for dz in (0, 1):
        for dy in (0, 1):
            for dx in (0, 1):
                idx_d = d0 + dz
                idx_h = h0 + dy
                idx_w = w0 + dx
                wgt = ((fd if dz else 1.0 - fd)
                       * (fh if dy else 1.0 - fh)
                       * (fw if dx else 1.0 - fw))
                valid = ((idx_d >= 0) & (idx_d < D)
                         & (idx_h >= 0) & (idx_h < H)
                         & (idx_w >= 0) & (idx_w < W))
                cd = jnp.clip(idx_d, 0, D - 1)
                ch = jnp.clip(idx_h, 0, H - 1)
                cw = jnp.clip(idx_w, 0, W - 1)
                flat = (cd * H + ch) * W + cw               # (B,G,J,K,Do,Ho,Wo)
                flat2 = flat.reshape(B, G, J, 1, K * N)
                flat2 = jnp.broadcast_to(flat2, (B, G, J, Cpg, K * N))
                corner = jnp.take_along_axis(x_g, flat2, axis=-1)
                corner = corner.reshape(B, G, J, Cpg, K, Do, Ho, Wo)
                coef = (wgt * valid.astype(jnp.float32))[:, :, :, None]  # over Cpg
                val = val + corner.astype(jnp.float32) * coef

    # Fold the modulation mask here (instead of streaming a second full-size
    # (B,G,CK,N) tensor through the GEMM kernel).
    val = val * attn_mask.astype(jnp.float32)[:, :, :, None]

    # columns ordered (cin_within_group = j*Cpg + c, k) to match the weight layout
    return val.reshape(B, G, J * Cpg * K, N)


# ----------------------------------------------------------------------------
# Module-equivalent forward
# ----------------------------------------------------------------------------
class DeformConv3d:
    def __init__(self, in_channels, out_channels, kernel_size, stride=1, padding=0,
                 dilation=1, groups=1, offset_field_channels_per_groups=1, bias=True,
                 modulation_type="none", *, key):
        assert in_channels % groups == 0 and out_channels % groups == 0
        assert in_channels % (groups * offset_field_channels_per_groups) == 0
        self.dim = 3
        self.kernel_size = to_3tuple(kernel_size)
        self.stride = to_3tuple(stride)
        self.padding = to_3tuple(padding)
        self.dilation = to_3tuple(dilation)
        self.groups = groups
        self.off_cpg = offset_field_channels_per_groups
        self.modulation_type = modulation_type.lower()
        self.in_channels = in_channels
        self.out_channels = out_channels

        K = _multiply_integers(self.kernel_size)
        off_out = groups * offset_field_channels_per_groups * K * (self.dim + 1)

        k1, k2, k3, k4 = jax.random.split(key, 4)
        # main deformable-conv weights (matches torch.randn init in the module)
        self.weight = jax.random.normal(
            k1, (out_channels, in_channels // groups, *self.kernel_size), jnp.float32)
        self.bias = jax.random.normal(k2, (out_channels,), jnp.float32) if bias else None
        # conv_off parameters (nn.Conv3d: same kernel/stride/pad/dilation/groups)
        self.w_off = 0.1 * jax.random.normal(
            k3, (off_out, in_channels // groups, *self.kernel_size), jnp.float32)
        self.b_off = 0.1 * jax.random.normal(k4, (off_out,), jnp.float32)

    # ---- plain-JAX glue shared by the Pallas path and the reference path ----
    def _prepare(self, x):
        B, Cin, D, H, W = x.shape
        G, J = self.groups, self.off_cpg
        K = _multiply_integers(self.kernel_size)
        Cout = self.out_channels
        CoutG = Cout // G

        # offset/mask generating conv
        off = lax.conv_general_dilated(
            x, self.w_off,
            window_strides=self.stride,
            padding=[(p, p) for p in self.padding],
            rhs_dilation=self.dilation,
            dimension_numbers=("NCDHW", "OIDHW", "NCDHW"),
            feature_group_count=G)
        off = off + self.b_off[None, :, None, None, None]
        _, _, Do, Ho, Wo = off.shape

        off = off.reshape(B, self.dim + 1, G * J * K, Do, Ho, Wo)
        offset_field = off[:, 0:self.dim]                 # (B,3,G*J*K,Do,Ho,Wo)
        attn_mask = off[:, self.dim:self.dim + 1]         # (B,1,G*J*K,Do,Ho,Wo)
        attn_mask = _apply_modulation_type(attn_mask, self.modulation_type, G)

        offset_field = offset_field.reshape(B, self.dim, G, J, K, Do, Ho, Wo)
        attn_mask = attn_mask.reshape(B, G, J, K, Do, Ho, Wo)

        # deformable im2col with the mask folded in -> (B, G, CK, N)
        cols_mod = _deform_im2col_modulated(
            x, offset_field, attn_mask, self.kernel_size, self.stride,
            self.padding, self.dilation, G, J)

        CK = (Cin // G) * K
        w_g = self.weight.reshape(G, CoutG, CK)
        bias = self.bias if self.bias is not None else jnp.zeros((Cout,), jnp.float32)
        bias_g = bias.reshape(G, CoutG)
        return cols_mod, w_g, bias_g, (Do, Ho, Wo)

    def __call__(self, x):
        B = x.shape[0]
        Cout = self.out_channels
        cols_mod, w_g, bias_g, (Do, Ho, Wo) = self._prepare(x)
        out = _dcn_gemm(w_g, cols_mod, bias_g)            # (B,G,CoutG,N) f32
        return out.reshape(B, Cout, Do, Ho, Wo)

    def reference(self, x):
        """Pure-JAX reference mirroring the kernel's bf16-operand / f32-acc math."""
        B = x.shape[0]
        Cout = self.out_channels
        cols_mod, w_g, bias_g, (Do, Ho, Wo) = self._prepare(x)
        w_b = w_g.astype(jnp.bfloat16).astype(jnp.float32)
        c_b = cols_mod.astype(jnp.bfloat16).astype(jnp.float32)
        ref = jnp.einsum("goc,bgcn->bgon", w_b, c_b,
                         preferred_element_type=jnp.float32)
        ref = ref + bias_g[None, :, :, None]
        return ref.reshape(B, Cout, Do, Ho, Wo)


if __name__ == "__main__":
    key = jax.random.PRNGKey(0)
    k_param, k_x = jax.random.split(key)

    B, Cin, Cout = 2, 4, 8
    D = H = W = 8
    module = DeformConv3d(Cin, Cout, kernel_size=3, stride=1, padding=1, dilation=1,
                          groups=2, offset_field_channels_per_groups=1, bias=True,
                          modulation_type="none", key=k_param)

    x = jax.random.normal(k_x, (B, Cin, D, H, W), jnp.float32)

    out = jax.block_until_ready(module(x))
    assert out.shape == (B, Cout, D, H, W)

    ref = jax.block_until_ready(module.reference(x))
    max_err = float(jnp.max(jnp.abs(out - ref)))
    assert jnp.allclose(out, ref, rtol=2e-2, atol=2e-2), max_err

    print("KERNEL_OK")
</pallas_src>

<mosaic_0001>
module attributes {stable_mosaic.version = 11 : i64} {
  func.func @_dcn_gemm_kernel(%arg0: i32, %arg1: i32, %arg2: i32, %arg3: memref<1x8x64xbf16, #tpu.memory_space<vmem>>, %arg4: memref<1x1x64x512xbf16, #tpu.memory_space<vmem>>, %arg5: memref<1x8x1xf32, #tpu.memory_space<vmem>>, %arg6: memref<1x1x8x512xf32, #tpu.memory_space<vmem>>) attributes {dimension_semantics = [#tpu.dimension_semantics<parallel>, #tpu.dimension_semantics<parallel>, #tpu.dimension_semantics<parallel>], iteration_bounds = array<i64: 2, 2, 1>, scalar_prefetch = 0 : i64, scratch_operands = 0 : i64, tpu.core_type = #tpu.core_type<tc>, window_params = [{transform_indices = @transform_0, window_bounds = array<i64: 1, 8, 64>}, {transform_indices = @transform_1, window_bounds = array<i64: 1, 1, 64, 512>}, {transform_indices = @transform_2, window_bounds = array<i64: 1, 8, 1>}, {transform_indices = @transform_3, window_bounds = array<i64: 1, 1, 8, 512>}]} {
    %c0 = arith.constant 0 : index
    %c0_0 = arith.constant 0 : index
    %c0_1 = arith.constant 0 : index
    %0 = vector.load %arg3[%c0, %c0_0, %c0_1] : memref<1x8x64xbf16, #tpu.memory_space<vmem>>, vector<1x8x64xbf16>
    %1 = vector.shape_cast %0 : vector<1x8x64xbf16> to vector<8x64xbf16>
    %c0_2 = arith.constant 0 : index
    %c0_3 = arith.constant 0 : index
    %c0_4 = arith.constant 0 : index
    %c0_5 = arith.constant 0 : index
    %2 = vector.load %arg4[%c0_2, %c0_3, %c0_4, %c0_5] : memref<1x1x64x512xbf16, #tpu.memory_space<vmem>>, vector<1x1x64x512xbf16>
    %3 = vector.shape_cast %2 : vector<1x1x64x512xbf16> to vector<64x512xbf16>
    %cst = arith.constant dense<0.000000e+00> : vector<8x512xf32>
    %4 = tpu.matmul %1, %3, %cst {dimension_numbers = #tpu.dot_dimension_numbers<[1], [0], [0], [1], [0, 0, 1, 1], [], []>} : vector<8x64xbf16>, vector<64x512xbf16>, vector<8x512xf32> -> vector<8x512xf32>
    %c0_6 = arith.constant 0 : index
    %c0_7 = arith.constant 0 : index
    %c0_8 = arith.constant 0 : index
    %5 = vector.load %arg5[%c0_6, %c0_7, %c0_8] : memref<1x8x1xf32, #tpu.memory_space<vmem>>, vector<1x8x1xf32>
    %6 = vector.shape_cast %5 : vector<1x8x1xf32> to vector<8x1xf32>
    %7 = vector.broadcast %6 : vector<8x1xf32> to vector<8x512xf32>
    %8 = arith.addf %4, %7 : vector<8x512xf32>
    %c0_9 = arith.constant 0 : index
    %c0_10 = arith.constant 0 : index
    %c0_11 = arith.constant 0 : index
    %c0_12 = arith.constant 0 : index
    %9 = vector.load %arg6[%c0_9, %c0_10, %c0_11, %c0_12] : memref<1x1x8x512xf32, #tpu.memory_space<vmem>>, vector<1x1x8x512xf32>
    %10 = vector.shape_cast %9 : vector<1x1x8x512xf32> to vector<8x512xf32>
    %11 = vector.shape_cast %8 : vector<8x512xf32> to vector<1x1x8x512xf32>
    tpu.vector_store %arg6[%c0_9, %c0_10, %c0_11, %c0_12], %11 {strides = array<i32>} : memref<1x1x8x512xf32, #tpu.memory_space<vmem>>, vector<1x1x8x512xf32>,
    return
  }
  func.func @transform_0(%arg0: i32, %arg1: i32, %arg2: i32) -> (i32, i32, i32) {
    %c0_i32 = arith.constant 0 : i32
    %c0_i32_0 = arith.constant 0 : i32
    %c0_i32_1 = arith.constant 0 : i32
    return %arg0, %c0_i32, %c0_i32_0 : i32, i32, i32
  }
  func.func @transform_1(%arg0: i32, %arg1: i32, %arg2: i32) -> (i32, i32, i32, i32) {
    %c0_i32 = arith.constant 0 : i32
    %c0_i32_0 = arith.constant 0 : i32
    return %arg1, %arg0, %c0_i32, %arg2 : i32, i32, i32, i32
  }
  func.func @transform_2(%arg0: i32, %arg1: i32, %arg2: i32) -> (i32, i32, i32) {
    %c0_i32 = arith.constant 0 : i32
    %c0_i32_0 = arith.constant 0 : i32
    %c0_i32_1 = arith.constant 0 : i32
    return %arg0, %c0_i32, %c0_i32_0 : i32, i32, i32
  }
  func.func @transform_3(%arg0: i32, %arg1: i32, %arg2: i32) -> (i32, i32, i32, i32) {
    %c0_i32 = arith.constant 0 : i32
    %c0_i32_0 = arith.constant 0 : i32
    return %arg1, %arg0, %c0_i32, %arg2 : i32, i32, i32, i32
  }
}

</mosaic_0001>

<bundles_post_ra>
// kernel: tpu_custom_call.1
= control target key start
LH: loop header
LB: loop body
LE: loop exit
PB: predicated region body
PF: predicated region fallthrough
CT: control target
= control target key end

     0   :  { %8 = vsyncpa [#allocation3], 0  ;;  %s1109_s0 = inlined_call_operand.vmem [shape: bf16[2,8,64], index: 0, kind: input, shape index: {}]   ;;  %s1110_s1 = inlined_call_operand.hbm [shape: bf16[2,2,64,512], index: 1, kind: input, shape index: {}]   ;;  %s1111_s2 = inlined_call_operand.vmem [shape: f32[2,8,1], index: 2, kind: input, shape index: {}]   ;;  %s1112_s3 = inlined_call_operand.hbm [shape: f32[2,2,8,512], index: 3, kind: output, shape index: {}]  }
   0x1   :  { %10 = vsyncpa [#allocation3 + $0x1], 0 }
   0x2   :  { %11 = vsyncpa [#allocation4], 0 }
   0x3   :  { %13 = vsyncpa [#allocation4 + $0x1], 0  ;;  %s885_s12 = smov 0   ;;  %s887_s13 = smov 0  }
   0x4   :  { %s889_s14 = smov 0   ;;  %s891_s15 = smov 0  }
   0x5   :  { %s893_s16 = smov 0   ;;  %s895_s17 = smov 0  }
   0x6   :  { %s897_s18 = smov 0   ;;  %s899_s19 = smov 0  }
   0x7 LB: > { %s587_s20 = sadd.s32 4294967295, %s858_s19   ;;  %s588_s21 = sadd.s32 4294967294, %s858_s19   ;;  %s858_s19 = sphi %s899_s19, %s19_s19   ;;  %s854_s18 = sphi %s897_s18, %s1130_s18   ;;  %s850_s17 = sphi %s895_s17, %s1129_s17   ;;  %s846_s16 = sphi %s893_s16, %s1128_s16   ;;  %s842_s15 = sphi %s891_s15, %s1127_s15   ;;  %s838_s14 = sphi %s889_s14, %s1126_s14   ;;  %s834_s13 = sphi %s887_s13, %s1125_s13   ;;  %s830_s12 = sphi %s885_s12, %s1124_s12  }
   0x8   : > { %s34_s22 = sadd.s32 1, %s850_s17  ;;  %s38_s23 = sadd.s32 1, %s854_s18 }
   0x9   : > { %p36_p0 = scmp.ge.s32.totalorder %s34_s22, 2  ;;  %s75_s24 = sadd.s32 1, %s838_s14 }
   0xa   : > { %p82_p1 = scmp.ne.s32.totalorder %s838_s14, %s834_s13  ;;  %p83_p2 = scmp.eq.s32.totalorder %s858_s19, 0 }
   0xb   : > { %s1132_s22 = smov (%p36_p0, %s34_s22), 0  ;;  %s1134_s23 = smov (!%p36_p0, %s38_s23), %s854_s18 }
   0xc   : > { %s68_s25 = ssub.s32 %s850_s17, %s1132_s22  ;;  %p938_p3 = por %p83_p2, %p82_p1 }
   0xd   : > { %p40_p4 = scmp.ge.s32.totalorder %s1134_s23, 2  ;;  %p88_p5 = scmp.ne.s32.totalorder %s834_s13, %s830_s12 }
   0xe   : > { %p89_p6 = scmp.eq.s32.totalorder %s587_s20, 0  ;;  %p142_p7 = scmp.eq.s32.totalorder %s587_s20, 3 }
   0xf   : > { %s1136_s23 = smov (%p40_p4, %s1134_s23), 0  ;;  %p148_p10 = scmp.eq.s32.totalorder %s588_s21, 3 }
  0x10   : > { %1116 = sst [smem:[#allocation8_spill]] %s1136_s23  ;;  %p946_p8 = por %p89_p6, %p88_p5 }
  0x11   : > { %p950_p9 = por %p142_p7, %p82_p1  ;;  %s69_s29 = ssub.s32 %s854_s18, %s1136_s23 }
  0x12   : > { %s70_s30 = sor.u32 %s69_s29, %s68_s25  ;;  %p956_p12 = por %p148_p10, %p88_p5 }
  0x13   : > { %s1118_s28 = scalar_select %p950_p9, 1, 0 }
  0x14   : > { %p73_p11 = scmp.eq.s32.totalorder %s70_s30, 0  ;;  %p636_p13 = scmp.lt.s32.totalorder %s858_s19, 4 }
  0x15   : > { %s1119_s4 = scalar_select %p956_p12, 1, 0 }
  0x16   : > { %s175_s5 = sand.u32 1, %s838_s14   ;;  %s592_s8 = sshll.u32 %s854_s18, 5 }
  0x17   : > { %s963_s6 = scalar_select %p73_p11, %s838_s14, %s75_s24  }
  0x18   : > { %s591_s7 = sshll.u32 %s175_s5, 7  ;;  %s593_s9 = sshll.u32 %s850_s17, 6 }
  0x19   : > { %s179_s10 = scalar_lea.vmem [#allocation2], %s591_s7  ;;  %s187_s20 = sadd.s32 %s593_s9, %s592_s8 }
  0x1a   : > { %s190_s11 = sshll.u32 %s179_s10, 4  ;;  %s594_s23 = sshll.u32 %s187_s20, 6  ;;  %s967_s11 = int_to_ptr.vmem [resolvable:$true] %s190_s11 }
  0x1b   : > { %p971_p0 = pnand %p636_p13, %p938_p3  ;;  %s978_s24 = scalar_lea.hbm %s1110_s1, %s594_s23 }
  0x1c   : > { %s980_s30 = scalar_lea.sflag [#allocation3], %s175_s5  ;;  %s730_s7 = scalar_lea.hbm %s978_s24, 2048 }
  0x1d   : > { %p731_p1 = scmp.ne.s32.totalorder %s978_s24, %s730_s7  ;;  %p732_p2 = pneg %p971_p0 }
  0x1e   : > { %s735_s9 = scalar_lea.hbm %s1110_s1, 8192  ;;  %p736_p5 = scmp.lt.u32.totalorder %s978_s24, %s1110_s1 }
  0x1f   : > { %p733_p3 = pnand %p732_p2, %p731_p1  ;;  %p737_p6 = scmp.lt.u32.totalorder %s735_s9, %s730_s7 }
  0x20   : > { %p739_p10 = scmp.lt.u32.totalorder %s730_s7, %s978_s24 }
  0x21   : > { %p734_p4 = pneg %p733_p3  ;;  %p738_p7 = por %p737_p6, %p736_p5 }
  0x23   : > { %p740_p11 = por %p739_p10, %p738_p7 }
  0x25   : > { %p741_p13 = pnand %p740_p11, %p734_p4 }
  0x27   : > { %744 = shalt.err (!%p741_p13)
}
  0x28   : > { %s745_s5 = scalar_lea.vmem %s967_s11, 2048  ;;  %s860_s20 = smov [#allocation2]  }
  0x29   : > { %p746_p1 = scmp.ne.s32.totalorder %s967_s11, %s745_s5  ;;  %s750_s25 = sshll.u32 %s860_s20, 4  ;;  %s751_s25 = int_to_ptr.vmem [resolvable:$false] %s750_s25 }
  0x2a   : > { %s752_s29 = scalar_lea.vmem %s751_s25, 4096  ;;  %p753_p9 = scmp.lt.s32.totalorder %s967_s11, %s751_s25 }
  0x2b   : > { %p748_p3 = pnand %p746_p1, %p732_p2  ;;  %p754_p5 = scmp.lt.s32.totalorder %s752_s29, %s745_s5 }
  0x2d   : > { %p749_p12 = pneg %p748_p3  ;;  %p755_p6 = por %p754_p5, %p753_p9 }
  0x2f   : > { %p756_p7 = pnand %p755_p6, %p749_p12 }
  0x31   : > { %759 = shalt.err (!%p756_p7)
}
  0x32   : > { %s861_s7 = smov 256   ;;  %s862_s26 = smov 16  }
  0x33   : > { %631 = dma.hbm_to_vmem [thread:$0]  (!%p971_p0), %s978_s24, 2048, %s967_s11, %s980_s30, %s861_s7, %s861_s7, %s862_s26  }
  0x34   : > { %p595_p2 = scmp.ge.s32.totalorder %s858_s19, 1  ;;  %p205_p4 = scmp.lt.s32.totalorder %s858_s19, 5 }
  0x36   : > { %p206_p10 = pnand %p595_p2, %p205_p4 }
  0x37   : > { %s1011_s8 = sand.u32 (!%p206_p10), 1, %s834_s13  }
  0x38   : > { %209 = sbr.rel (%p206_p10) target bundleno = 312 (0x138), region = 32  ;;  %s596_s9 = sshll.u32 (!%p206_p10), %s1011_s8, 7 }
  0x39   : > { %s212_s23 = scalar_lea.sflag (!%p206_p10), [#allocation3], %s1011_s8  ;;  %s1015_s10 = scalar_lea.vmem (!%p206_p10), [#allocation2], %s596_s9 }
  0x3f   : > { %821 = dma.done.wait (%p946_p8), %s212_s23, 2048  }
  0x40   : > { %823 = vsyncadd (%p946_p8), %s212_s23, 4294965248  ;;  %v863_v0 = vmov 0   ;;  %p246_p9 = scmp.lt.s32.totalorder %s846_s16, 1  ;;  %v706_v1 = vld [vmem:[%s1015_s10 + $0x4] ss:$16 sps:$4 sm:$0xff]   ;;  %vm360_vm0 = vcmask 523264  }
  0x41   : > { %396 = vmatprep.mubr.bf16.mxu0 %v863_v0  ;;  %437 = vmatprep.mubr.bf16.mxu1 %v863_v0  ;;  %v708_v2 = vld [vmem:[%s1015_s10 + $0xc] ss:$16 sps:$4 sm:$0xff]   ;;  %v710_v3 = vld [vmem:[%s1015_s10] ss:$16 sps:$4 sm:$0xff]   ;;  %v711_v4 = vld [vmem:[%s1015_s10 + $0x8] ss:$16 sps:$4 sm:$0xff]  }
  0x42   : > { %705 = vset.pattern.permute.xlu0 %v863_v0  ;;  %364 = vmatprep.subr.bf16.mxu0 %v706_v1  ;;  %v712_v5 = vld [vmem:[%s1015_s10 + $0x24] ss:$16 sps:$4 sm:$0xff]   ;;  %s1028_s27 = scalar_select %p246_p9, %s846_s16, 1  ;;  %v714_v6 = vld [vmem:[%s1015_s10 + $0x2c] ss:$16 sps:$4 sm:$0xff]  }
  0x43   : > { %405 = vmatprep.subr.bf16.mxu1 %v708_v2  ;;  %365 = vmatpush1.bf16.msra.mxu0 %v710_v3  ;;  %v716_v7 = vld [vmem:[%s1015_s10 + $0x20] ss:$16 sps:$4 sm:$0xff]   ;;  %v717_v8 = vld [vmem:[%s1015_s10 + $0x28] ss:$16 sps:$4 sm:$0xff]   ;;  %v718_v9 = vld [vmem:[%s1015_s10 + $0x44] ss:$16 sps:$4 sm:$0xff]  }
  0x44   : > { %406 = vmatpush1.bf16.msra.mxu1 %v711_v4  ;;  %366 = vmatprep.subr.bf16.mxu0 %v712_v5  ;;  %s599_s11 = sshll.u32 %s1028_s27, 3  ;;  %v720_v10 = vld [vmem:[%s1015_s10 + $0x4c] ss:$16 sps:$4 sm:$0xff]   ;;  %v722_v11 = vld [vmem:[%s1015_s10 + $0x40] ss:$16 sps:$4 sm:$0xff]   ;;  %s598_s5 = sshll.u32 %s1028_s27, 2 }
  0x45   : > { %407 = vmatprep.subr.bf16.mxu1 %v714_v6  ;;  %v723_v12 = vld [vmem:[%s1015_s10 + $0x48] ss:$16 sps:$4 sm:$0xff]   ;;  %v724_v13 = vld [vmem:[%s1015_s10 + $0x64] ss:$16 sps:$4 sm:$0xff]   ;;  %s254_s30 = scalar_lea.vmem %s1111_s2, %s599_s11  ;;  %v726_v14 = vld [vmem:[%s1015_s10 + $0x6c] ss:$16 sps:$4 sm:$0xff]   ;;  %s249_s29 = scalar_lea.vmem %s1109_s0, %s598_s5 }
  0x46   : > { %v274_v15 = vld [vmem:[%s254_s30] sm:$0xff]  ;;  %v729_v17 = vld [vmem:[%s1015_s10 + $0x68] ss:$16 sps:$4 sm:$0xff]   ;;  %s597_s7 = sshll.u32 %s1011_s8, 5  ;;  %s619_s26 = sshll.u32 %s846_s16, 2 }
  0x47   : > { %367 = vmatpush1.bf16.msra.mxu0 %v716_v7  ;;  %v728_v16 = vld [vmem:[%s1015_s10 + $0x60] ss:$16 sps:$4 sm:$0xff]   ;;  %277 = vperm.xlu0 %705, %v274_v15   ;;  %s620_s9 = sshll.u32 %s842_s15, 3  ;;  %s245_s10 = scalar_lea.vmem [#allocation5], %s597_s7 }
  0x48   : > { %408 = vmatpush1.bf16.msra.mxu1 %v717_v8  ;;  %368 = vmatprep.subr.bf16.mxu0 %v718_v9  ;;  %v257_v18 = vld [vmem:[%s249_s29] sm:$0xf]  ;;  %s465_s23 = sadd.s32 %s620_s9, %s619_s26  ;;  %s469_s11 = sshll.u32 %s245_s10, 4  ;;  %s1057_s11 = int_to_ptr.vmem [resolvable:$true] %s469_s11 }
  0x49   : > { %409 = vmatprep.subr.bf16.mxu1 %v720_v10  ;;  %s621_s27 = sshll.u32 %s465_s23, 7  ;;  %s451_s24 = scalar_lea.sflag [#allocation4], %s1011_s8 }
  0x4a   : > { %s1055_s15 = scalar_lea.hbm %s1112_s3, %s621_s27  ;;  %s760_s30 = scalar_lea.vmem %s1057_s11, 512 }
  0x4b   : > { %369 = vmatpush1.bf16.msra.mxu0 %v722_v11  ;;  %p761_p8 = scmp.ne.s32.totalorder %s1057_s11, %s760_s30  ;;  %p1121_p12 = scmp.ne.s32.totalorder %s1118_s28, 0 }
  0x4c   : > { %410 = vmatpush1.bf16.msra.mxu1 %v723_v12  ;;  %370 = vmatprep.subr.bf16.mxu0 %v724_v13  ;;  %s864_s5 = smov [#allocation5]  }
  0x4d   : > { %411 = vmatprep.subr.bf16.mxu1 %v726_v14  ;;  %p762_p0 = pnand %p761_p8, %p1121_p12  ;;  %s764_s20 = sshll.u32 %s864_s5, 4  ;;  %s765_s20 = int_to_ptr.vmem [resolvable:$false] %s764_s20 }
  0x4e   : > { %s766_s25 = scalar_lea.vmem %s765_s20, 1024  ;;  %p767_p13 = scmp.lt.s32.totalorder %s1057_s11, %s765_s20 }
  0x4f   : > { %371 = vmatpush1.bf16.msra.mxu0 %v728_v16  ;;  %p763_p11 = pneg %p762_p0  ;;  %p768_p1 = scmp.lt.s32.totalorder %s766_s25, %s760_s30 }
  0x50   : > { %412 = vmatpush1.bf16.msra.mxu1 %v729_v17 }
  0x51   : > { %p769_p3 = por %p768_p1, %p767_p13 }
  0x52   : > { %616 = vmatmul.mubr.msk.bf16.vlgmr.msra.gmra.mrb[0].mxu0 %vm360_vm0, %v257_v18 }
  0x53   : > { %617 = vmatmul.mubr.msk.bf16.vlgmr.msra.gmra.mrb[0].mxu1 %vm360_vm0, %v257_v18  ;;  %p770_p5 = pnand %p769_p3, %p763_p11 }
  0xc6   : > { %v278_v19 = vpop.permute.xlu0 %277 }
 0x125   : > { %v398_v20 = vpop.f32.mrb[0].mxu0 }
 0x126   : > { %v439_v21 = vpop.f32.mrb[0].mxu1  ;;  %v399_v22 = vadd.f32 %v398_v20, %v278_v19  ;;  %v400_v24 = vpop.f32.mrb[1].mxu0 }
 0x127   : > { %v440_v23 = vadd.f32 %v439_v21, %v278_v19  ;;  %v441_v25 = vpop.f32.mrb[1].mxu1  ;;  %v401_v26 = vadd.f32 %v400_v24, %v278_v19  ;;  %v402_v28 = vpop.f32.mrb[2].mxu0 }
 0x128   : > { %v442_v27 = vadd.f32 %v441_v25, %v278_v19  ;;  %v443_v29 = vpop.f32.mrb[2].mxu1  ;;  %446 = vst [vmem:[%s245_s10] sm:$0xff] %v399_v22  ;;  %v403_v30 = vpop.f32.mrb[3].mxu0 }
 0x129   : > { %448 = vst [vmem:[%s245_s10 + $0x10] sm:$0xff] %v440_v23  ;;  %v444_v31 = vpop.f32.mrb[3].mxu1  ;;  %447 = vst [vmem:[%s245_s10 + $0x8] sm:$0xff] %v401_v26 }
 0x12a   : > { %449 = vst [vmem:[%s245_s10 + $0x18] sm:$0xff] %v442_v27 }
 0x12b   : > { %773 = shalt.err (!%p770_p5)
}
 0x12c   : > { %s774_s8 = scalar_lea.hbm %s1055_s15, 512  ;;  %s778_s26 = scalar_lea.hbm %s1112_s3, 2048 }
 0x12d   : > { %p775_p6 = scmp.ne.s32.totalorder %s1055_s15, %s774_s8  ;;  %p779_p4 = scmp.lt.u32.totalorder %s1055_s15, %s1112_s3 }
 0x12e   : > { %p780_p10 = scmp.lt.u32.totalorder %s778_s26, %s774_s8  ;;  %p782_p8 = scmp.lt.u32.totalorder %s774_s8, %s1055_s15 }
 0x12f   : > { %p776_p7 = pnand %p775_p6, %p1121_p12 }
 0x130   : > { %p781_p9 = por %p780_p10, %p779_p4 }
 0x131   : > { %p777_p2 = pneg %p776_p7 }
 0x132   : > { %p783_p0 = por %p782_p8, %p781_p9 }
 0x134   : > { %p784_p11 = pnand %p783_p0, %p777_p2 }
 0x136   : > { %787 = shalt.err (!%p784_p11)
}
 0x137   : > { %626 = dma.vmem_to_hbm [thread:$0]  (%p1121_p12), %s1057_s11, 512, %s1055_s15, %s451_s24  }
 0x138 PF: > { %p637_p13 = scmp.ge.s32.totalorder %s858_s19, 2  ;;  %s481_s27 = sand.u32 1, %s830_s12  }
 0x139   : > { %p1122_p1 = scmp.ne.s32.totalorder %s1119_s4, 0  ;;  %s482_s10 = scalar_lea.sflag [#allocation4], %s481_s27 }
 0x13b   : > { %p633_p3 = pnand %p637_p13, %p1122_p1 }
 0x13d   : > { %825 = dma.done.wait (!%p633_p3), %s482_s10, 512  }
 0x13e   : > { %827 = vsyncadd (!%p633_p3), %s482_s10, 4294966784  ;;  %s19_s19 = sadd.s32 1, %s858_s19   ;;  %s1123_s28 = sld [smem:[#allocation8_spill]] }
 0x13f   : > { %p16_p5 = scmp.ge.s32.totalorder %s19_s19, 6   ;;  %s1124_s12 = smov %s834_s13 }
 0x140   : > { %s1125_s13 = smov %s838_s14  ;;  %s1126_s14 = smov %s963_s6 }
 0x141   : > { %s1127_s15 = smov %s850_s17  ;;  %s1128_s16 = smov %s854_s18 }
 0x142   : > { %s1129_s17 = smov %s1132_s22  ;;  %18 = sbr.rel (!%p16_p5) target bundleno = 7 (0x7), region = 83 }
 0x144   : > { %s1130_s18 = smov %s1123_s28 }
 0x149   :  { %487 = vsyncpa [#allocation3], 1 }
 0x14a   :  { %489 = vsyncpa [#allocation3 + $0x1], 1 }
 0x14b   :  { %490 = vsyncpa [#allocation4], 1 }
 0x14c   :  { %492 = vsyncpa [#allocation4 + $0x1], 1 }

</bundles_post_ra>
